<compile_context>
chip_gen: v6e
topology: v6e:2x2x1
jax: 0.10.0
libtpu: 0.0.40
codegen_flags: <defaults>
</compile_context>

<pallas_src>
import functools

import jax
import jax.numpy as jnp
from jax.experimental import pallas as pl
from jax.experimental.pallas import tpu as pltpu


def _round_up(n: int, m: int) -> int:
    return ((n + m - 1) // m) * m


def _pin_kernel(x_ref,
                w1_ref, b1_ref, w2_ref, b2_ref,   # phi params (w2 pre-scaled by 1/S)
                w3_ref, b3_ref, w4_ref, b4_ref,   # rho params (w4/b4 lane-padded)
                o_ref, *, tb, s):
    # x block: (TB*S, Din) -- TB batch elements' set rows, flattened row-major.
    x = x_ref[...]

    # ---- phi layer 1 + ReLU over all TB*S rows (the only large matmul) ----
    h = jnp.dot(x, w1_ref[...], preferred_element_type=jnp.float32) + b1_ref[...]
    h = jnp.maximum(h, 0.0)                                   # (TB*S, H)

    # ---- mixer: mean over the set dim, hoisted before phi layer 2 ----
    # mean is linear => mean(h @ w2 + b2) == mean(h) @ w2 + b2; the 1/S factor
    # is folded into w2 at trace time, so a plain sum suffices here.
    pooled = jnp.sum(h.reshape(tb, s, h.shape[-1]), axis=1)   # (TB, H)

    # ---- phi layer 2 on pooled rows (S-fold fewer FLOPs than pre-pool) ----
    z = jnp.dot(pooled, w2_ref[...],
                preferred_element_type=jnp.float32) + b2_ref[...]   # (TB, H)

    # ---- rho: Linear -> ReLU -> Linear, batched over TB rows ----
    r = jnp.dot(z, w3_ref[...], preferred_element_type=jnp.float32) + b3_ref[...]
    r = jnp.maximum(r, 0.0)                                   # (TB, H2)
    y = jnp.dot(r, w4_ref[...], preferred_element_type=jnp.float32) + b4_ref[...]
    # (TB, Dout_padded) -- lane-dense, unmasked store

    o_ref[...] = y.astype(o_ref.dtype)


def permutation_invariant_network(x, params, *, tb=128, mxu_dtype=None):
    """x: (B, S, D_in) float32. params: dict of phi/rho weights/biases.

    tb:        batch tile (rows per grid step); rounded down to the padded
               batch for tiny inputs. 128 (v5e) / 256 (v6e, or v7x if VMEM allows).
    mxu_dtype: optional lower-precision MXU operand dtype (e.g. jnp.bfloat16 on
               v6e/v7x). Accumulation stays f32; biases/ReLU stay f32.
    """
    B, S, Din = x.shape
    w1, b1, w2, b2 = params["w1"], params["b1"], params["w2"], params["b2"]
    w3, b3, w4, b4 = params["w3"], params["b3"], params["w4"], params["b4"]
    Dout = w4.shape[1]

    # Fold the mixer's 1/S into w2 (kernel sums over the set instead of averaging).
    w2s = w2 * (1.0 / S)

    # Lane-dense output: pad Dout up to a multiple of 128 with zero columns.
    Dout_p = _round_up(Dout, 128)
    if Dout_p != Dout:
        w4p = jnp.pad(w4, ((0, 0), (0, Dout_p - Dout)))
        b4p = jnp.pad(b4, ((0, 0), (0, Dout_p - Dout)))
    else:
        w4p, b4p = w4, b4

    # Batch tile: multiple of 8 (f32 sublanes); pad batch to a multiple of TB.
    TB = min(tb, _round_up(B, 8))
    Bp = _round_up(B, TB)
    if Bp != B:
        x = jnp.pad(x, ((0, Bp - B), (0, 0), (0, 0)))
    x2 = x.reshape(Bp * S, Din)   # 2D, (8,128)-friendly, no size-1 block dims

    # Optional bf16 MXU operands (f32 accumulation via preferred_element_type).
    if mxu_dtype is not None:
        x2 = x2.astype(mxu_dtype)
        w1c, w2c, w3c, w4c = (a.astype(mxu_dtype) for a in (w1, w2s, w3, w4p))
    else:
        w1c, w2c, w3c, w4c = w1, w2s, w3, w4p

    grid = (Bp // TB,)
    full = lambda shape: pl.BlockSpec(shape, lambda b: (0,) * len(shape))
    kernel = functools.partial(_pin_kernel, tb=TB, s=S)

    out = pl.pallas_call(
        kernel,
        out_shape=jax.ShapeDtypeStruct((Bp, Dout_p), jnp.float32),
        grid=grid,
        in_specs=[
            pl.BlockSpec((TB * S, Din), lambda b: (b, 0)),    # x (flattened set rows)
            full(w1c.shape), full(b1.shape),                  # phi layer 1
            full(w2c.shape), full(b2.shape),                  # phi layer 2 (1/S folded)
            full(w3c.shape), full(b3.shape),                  # rho layer 1
            full(w4c.shape), full(b4p.shape),                 # rho layer 2 (lane-padded)
        ],
        out_specs=pl.BlockSpec((TB, Dout_p), lambda b: (b, 0)),
        compiler_params=pltpu.CompilerParams(
            dimension_semantics=("parallel",)),
    )(x2, w1c, b1, w2c, b2, w3c, b3, w4c, b4p)

    return out[:B, :Dout]


def _reference(x, params):
    """Pure-JAX reference mirroring the PyTorch forward (no algebraic hoists)."""
    w1, b1, w2, b2 = params["w1"], params["b1"], params["w2"], params["b2"]
    w3, b3, w4, b4 = params["w3"], params["b3"], params["w4"], params["b4"]
    # phi
    z = jnp.maximum(x @ w1 + b1, 0.0) @ w2 + b2               # (B, S, H)
    # mixer (dim = ndim - 2)
    z = jnp.mean(z, axis=z.ndim - 2)                          # (B, H)
    # rho
    return jnp.maximum(z @ w3 + b3, 0.0) @ w4 + b4            # (B, D_out)


def _init_params(key, d_in, hidden, hidden2, d_out):
    ks = jax.random.split(key, 8)
    def lin(kw, kb, fan_in, fan_out):
        bound = 1.0 / jnp.sqrt(fan_in)
        w = jax.random.uniform(kw, (fan_in, fan_out), jnp.float32, -bound, bound)
        b = jax.random.uniform(kb, (1, fan_out), jnp.float32, -bound, bound)
        return w, b
    w1, b1 = lin(ks[0], ks[1], d_in, hidden)
    w2, b2 = lin(ks[2], ks[3], hidden, hidden)
    w3, b3 = lin(ks[4], ks[5], hidden, hidden2)
    w4, b4 = lin(ks[6], ks[7], hidden2, d_out)
    return dict(w1=w1, b1=b1, w2=w2, b2=b2, w3=w3, b3=b3, w4=w4, b4=b4)


if __name__ == "__main__":
    key = jax.random.PRNGKey(0)
    k_x, k_p = jax.random.split(key)

    B, S, D_IN = 2, 8, 16        # batch, set size, input features
    HIDDEN, HIDDEN2, D_OUT = 32, 32, 8

    x = jax.random.normal(k_x, (B, S, D_IN), dtype=jnp.float32)
    params = _init_params(k_p, D_IN, HIDDEN, HIDDEN2, D_OUT)

    out = permutation_invariant_network(x, params)
    out = jax.block_until_ready(out)

    ref = _reference(x, params)
    assert out.shape == (B, D_OUT)
    assert jnp.allclose(out, ref, atol=1e-5, rtol=1e-5)

    print("KERNEL_OK")
</pallas_src>

<mosaic_0001>
module attributes {stable_mosaic.version = 11 : i64} {
  func.func @_pin_kernel(%arg0: i32, %arg1: memref<64x16xf32, #tpu.memory_space<vmem>>, %arg2: memref<16x32xf32, #tpu.memory_space<vmem>>, %arg3: memref<1x32xf32, #tpu.memory_space<vmem>>, %arg4: memref<32x32xf32, #tpu.memory_space<vmem>>, %arg5: memref<1x32xf32, #tpu.memory_space<vmem>>, %arg6: memref<32x32xf32, #tpu.memory_space<vmem>>, %arg7: memref<1x32xf32, #tpu.memory_space<vmem>>, %arg8: memref<32x128xf32, #tpu.memory_space<vmem>>, %arg9: memref<1x128xf32, #tpu.memory_space<vmem>>, %arg10: memref<8x128xf32, #tpu.memory_space<vmem>>) attributes {dimension_semantics = [#tpu.dimension_semantics<parallel>], iteration_bounds = array<i64: 1>, scalar_prefetch = 0 : i64, scratch_operands = 0 : i64, tpu.core_type = #tpu.core_type<tc>, window_params = [{transform_indices = @transform_0, window_bounds = array<i64: 64, 16>}, {pipeline_mode = #tpu.pipeline_mode<synchronous>, transform_indices = @transform_1, window_bounds = array<i64: 16, 32>}, {pipeline_mode = #tpu.pipeline_mode<synchronous>, transform_indices = @transform_2, window_bounds = array<i64: 1, 32>}, {pipeline_mode = #tpu.pipeline_mode<synchronous>, transform_indices = @transform_3, window_bounds = array<i64: 32, 32>}, {pipeline_mode = #tpu.pipeline_mode<synchronous>, transform_indices = @transform_4, window_bounds = array<i64: 1, 32>}, {pipeline_mode = #tpu.pipeline_mode<synchronous>, transform_indices = @transform_5, window_bounds = array<i64: 32, 32>}, {pipeline_mode = #tpu.pipeline_mode<synchronous>, transform_indices = @transform_6, window_bounds = array<i64: 1, 32>}, {pipeline_mode = #tpu.pipeline_mode<synchronous>, transform_indices = @transform_7, window_bounds = array<i64: 32, 128>}, {pipeline_mode = #tpu.pipeline_mode<synchronous>, transform_indices = @transform_8, window_bounds = array<i64: 1, 128>}, {transform_indices = @transform_9, window_bounds = array<i64: 8, 128>}]} {
    %c0 = arith.constant 0 : index
    %c0_0 = arith.constant 0 : index
    %0 = vector.load %arg1[%c0, %c0_0] : memref<64x16xf32, #tpu.memory_space<vmem>>, vector<64x16xf32>
    %c0_1 = arith.constant 0 : index
    %c0_2 = arith.constant 0 : index
    %1 = vector.load %arg2[%c0_1, %c0_2] : memref<16x32xf32, #tpu.memory_space<vmem>>, vector<16x32xf32>
    %cst = arith.constant dense<0.000000e+00> : vector<64x32xf32>
    %2 = tpu.matmul %0, %1, %cst {dimension_numbers = #tpu.dot_dimension_numbers<[1], [0], [0], [1], [0, 0, 1, 1], [], []>} : vector<64x16xf32>, vector<16x32xf32>, vector<64x32xf32> -> vector<64x32xf32>
    %c0_3 = arith.constant 0 : index
    %c0_4 = arith.constant 0 : index
    %3 = vector.load %arg3[%c0_3, %c0_4] : memref<1x32xf32, #tpu.memory_space<vmem>>, vector<1x32xf32>
    %4 = vector.broadcast %3 : vector<1x32xf32> to vector<64x32xf32>
    %5 = arith.addf %2, %4 : vector<64x32xf32>
    %cst_5 = arith.constant 0.000000e+00 : f32
    %6 = vector.broadcast %cst_5 : f32 to vector<64x32xf32>
    %7 = arith.maximumf %5, %6 : vector<64x32xf32>
    %8 = vector.shape_cast %7 : vector<64x32xf32> to vector<8x8x32xf32>
    %cst_6 = arith.constant dense<0.000000e+00> : vector<8x32xf32>
    %9 = vector.multi_reduction <add>, %8, %cst_6 [1] : vector<8x8x32xf32> to vector<8x32xf32>
    %c0_7 = arith.constant 0 : index
    %c0_8 = arith.constant 0 : index
    %10 = vector.load %arg4[%c0_7, %c0_8] : memref<32x32xf32, #tpu.memory_space<vmem>>, vector<32x32xf32>
    %cst_9 = arith.constant dense<0.000000e+00> : vector<8x32xf32>
    %11 = tpu.matmul %9, %10, %cst_9 {dimension_numbers = #tpu.dot_dimension_numbers<[1], [0], [0], [1], [0, 0, 1, 1], [], []>} : vector<8x32xf32>, vector<32x32xf32>, vector<8x32xf32> -> vector<8x32xf32>
    %c0_10 = arith.constant 0 : index
    %c0_11 = arith.constant 0 : index
    %12 = vector.load %arg5[%c0_10, %c0_11] : memref<1x32xf32, #tpu.memory_space<vmem>>, vector<1x32xf32>
    %13 = vector.broadcast %12 : vector<1x32xf32> to vector<8x32xf32>
    %14 = arith.addf %11, %13 : vector<8x32xf32>
    %c0_12 = arith.constant 0 : index
    %c0_13 = arith.constant 0 : index
    %15 = vector.load %arg6[%c0_12, %c0_13] : memref<32x32xf32, #tpu.memory_space<vmem>>, vector<32x32xf32>
    %cst_14 = arith.constant dense<0.000000e+00> : vector<8x32xf32>
    %16 = tpu.matmul %14, %15, %cst_14 {dimension_numbers = #tpu.dot_dimension_numbers<[1], [0], [0], [1], [0, 0, 1, 1], [], []>} : vector<8x32xf32>, vector<32x32xf32>, vector<8x32xf32> -> vector<8x32xf32>
    %c0_15 = arith.constant 0 : index
    %c0_16 = arith.constant 0 : index
    %17 = vector.load %arg7[%c0_15, %c0_16] : memref<1x32xf32, #tpu.memory_space<vmem>>, vector<1x32xf32>
    %18 = vector.broadcast %17 : vector<1x32xf32> to vector<8x32xf32>
    %19 = arith.addf %16, %18 : vector<8x32xf32>
    %cst_17 = arith.constant 0.000000e+00 : f32
    %20 = vector.broadcast %cst_17 : f32 to vector<8x32xf32>
    %21 = arith.maximumf %19, %20 : vector<8x32xf32>
    %c0_18 = arith.constant 0 : index
    %c0_19 = arith.constant 0 : index
    %22 = vector.load %arg8[%c0_18, %c0_19] : memref<32x128xf32, #tpu.memory_space<vmem>>, vector<32x128xf32>
    %cst_20 = arith.constant dense<0.000000e+00> : vector<8x128xf32>
    %23 = tpu.matmul %21, %22, %cst_20 {dimension_numbers = #tpu.dot_dimension_numbers<[1], [0], [0], [1], [0, 0, 1, 1], [], []>} : vector<8x32xf32>, vector<32x128xf32>, vector<8x128xf32> -> vector<8x128xf32>
    %c0_21 = arith.constant 0 : index
    %c0_22 = arith.constant 0 : index
    %24 = vector.load %arg9[%c0_21, %c0_22] : memref<1x128xf32, #tpu.memory_space<vmem>>, vector<1x128xf32>
    %25 = vector.broadcast %24 : vector<1x128xf32> to vector<8x128xf32>
    %26 = arith.addf %23, %25 : vector<8x128xf32>
    %c0_23 = arith.constant 0 : index
    %c0_24 = arith.constant 0 : index
    %27 = vector.load %arg10[%c0_23, %c0_24] : memref<8x128xf32, #tpu.memory_space<vmem>>, vector<8x128xf32>
    tpu.vector_store %arg10[%c0_23, %c0_24], %26 {strides = array<i32>} : memref<8x128xf32, #tpu.memory_space<vmem>>, vector<8x128xf32>,
    return
  }
  func.func @transform_0(%arg0: i32) -> (i32, i32) {
    %c0_i32 = arith.constant 0 : i32
    %c0_i32_0 = arith.constant 0 : i32
    return %arg0, %c0_i32 : i32, i32
  }
  func.func @transform_1(%arg0: i32) -> (i32, i32) {
    %c0_i32 = arith.constant 0 : i32
    %c0_i32_0 = arith.constant 0 : i32
    %c0_i32_1 = arith.constant 0 : i32
    return %c0_i32, %c0_i32_0 : i32, i32
  }
  func.func @transform_2(%arg0: i32) -> (i32, i32) {
    %c0_i32 = arith.constant 0 : i32
    %c0_i32_0 = arith.constant 0 : i32
    %c0_i32_1 = arith.constant 0 : i32
    return %c0_i32, %c0_i32_0 : i32, i32
  }
  func.func @transform_3(%arg0: i32) -> (i32, i32) {
    %c0_i32 = arith.constant 0 : i32
    %c0_i32_0 = arith.constant 0 : i32
    %c0_i32_1 = arith.constant 0 : i32
    return %c0_i32, %c0_i32_0 : i32, i32
  }
  func.func @transform_4(%arg0: i32) -> (i32, i32) {
    %c0_i32 = arith.constant 0 : i32
    %c0_i32_0 = arith.constant 0 : i32
    %c0_i32_1 = arith.constant 0 : i32
    return %c0_i32, %c0_i32_0 : i32, i32
  }
  func.func @transform_5(%arg0: i32) -> (i32, i32) {
    %c0_i32 = arith.constant 0 : i32
    %c0_i32_0 = arith.constant 0 : i32
    %c0_i32_1 = arith.constant 0 : i32
    return %c0_i32, %c0_i32_0 : i32, i32
  }
  func.func @transform_6(%arg0: i32) -> (i32, i32) {
    %c0_i32 = arith.constant 0 : i32
    %c0_i32_0 = arith.constant 0 : i32
    %c0_i32_1 = arith.constant 0 : i32
    return %c0_i32, %c0_i32_0 : i32, i32
  }
  func.func @transform_7(%arg0: i32) -> (i32, i32) {
    %c0_i32 = arith.constant 0 : i32
    %c0_i32_0 = arith.constant 0 : i32
    %c0_i32_1 = arith.constant 0 : i32
    return %c0_i32, %c0_i32_0 : i32, i32
  }
  func.func @transform_8(%arg0: i32) -> (i32, i32) {
    %c0_i32 = arith.constant 0 : i32
    %c0_i32_0 = arith.constant 0 : i32
    %c0_i32_1 = arith.constant 0 : i32
    return %c0_i32, %c0_i32_0 : i32, i32
  }
  func.func @transform_9(%arg0: i32) -> (i32, i32) {
    %c0_i32 = arith.constant 0 : i32
    %c0_i32_0 = arith.constant 0 : i32
    return %arg0, %c0_i32 : i32, i32
  }
}

</mosaic_0001>

<bundles_post_ra>
// kernel: tpu_custom_call.1
= control target key start
LH: loop header
LB: loop body
LE: loop exit
PB: predicated region body
PF: predicated region fallthrough
CT: control target
= control target key end

     0   :  { %14 = vsyncpa [#allocation3], 0  ;;  %s853_s0 = inlined_call_operand.vmem [shape: f32[64,16], index: 0, kind: input, shape index: {}]   ;;  %s854_s1 = inlined_call_operand.vmem [shape: f32[16,32], index: 1, kind: input, shape index: {}]   ;;  %s855_s2 = inlined_call_operand.vmem [shape: f32[1,32], index: 2, kind: input, shape index: {}]   ;;  %s856_s3 = inlined_call_operand.vmem [shape: f32[32,32], index: 3, kind: input, shape index: {}]   ;;  %s857_s4 = inlined_call_operand.vmem [shape: f32[1,32], index: 4, kind: input, shape index: {}]   ;;  %s858_s5 = inlined_call_operand.vmem [shape: f32[32,32], index: 5, kind: input, shape index: {}]   ;;  %s859_s6 = inlined_call_operand.vmem [shape: f32[1,32], index: 6, kind: input, shape index: {}]   ;;  %s860_s7 = inlined_call_operand.hbm [shape: f32[32,128], index: 7, kind: input, shape index: {}]   ;;  %s861_s8 = inlined_call_operand.vmem [shape: f32[1,128], index: 8, kind: input, shape index: {}]   ;;  %s862_s9 = inlined_call_operand.hbm [shape: f32[8,128], index: 9, kind: output, shape index: {}]  }
   0x1   :  { %15 = vsyncpa [#allocation4], 0  ;;  %s688_s30 = smov [#allocation2]  }
   0x2   :  { %s35_s10 = sshll.u32 %s688_s30, 4  ;;  %s36_s10 = int_to_ptr.vmem [resolvable:$true] %s35_s10 }
   0x3   :  { %s652_s11 = scalar_lea.vmem %s36_s10, 512  ;;  %p657_p1 = scmp.lt.s32.totalorder %s36_s10, %s36_s10 }
   0x4   :  { %p653_p0 = scmp.ne.s32.totalorder %s36_s10, %s652_s11  ;;  %p658_p2 = scmp.lt.s32.totalorder %s652_s11, %s652_s11 }
   0x6   :  { %p659_p3 = por %p658_p2, %p657_p1 }
   0x8   :  { %p660_p4 = pnand %p659_p3, %p653_p0 }
   0xa   :  { %663 = shalt.err (!%p660_p4)
}
   0xb   :  { %s689_s12 = smov 128   ;;  %s690_s13 = smov 8  }
   0xc   :  { %41 = dma.hbm_to_vmem [thread:$0]  %s860_s7, 512, %s36_s10, [#allocation3], %s689_s12, %s689_s12, %s690_s13  }
   0xd   :  { %684 = dma.done.wait [#allocation3], 512  }
   0xe   :  { %685 = vsyncadd [#allocation3], 4294966784  ;;  %vm64_vm0 = vcmask 130048   ;;  %v56_v0 = vld [vmem:[%s854_s1 + $0x8] sm:$0xff]  ;;  %v55_v1 = vld [vmem:[%s854_s1] sm:$0xff]  ;;  %v691_v10 = vmov 0.0  }
   0xf   :  { %v47_v2 = vld [vmem:[%s853_s0] sm:$0xff]  ;;  %589 = vmatprep.subr.mxu0 %v56_v0  ;;  %v48_v3 = vld [vmem:[%s853_s0 + $0x8] sm:$0xff]  ;;  %v49_v4 = vld [vmem:[%s853_s0 + $0x10] sm:$0xff]  ;;  %605 = vmatprep.subr.mxu1 %v691_v10  ;;  %vm692_vm1 = vmmov 0   ;;  %vm202_vm2 = vcmask 261120   ;;  %vm278_vm3 = vcmask 1041409  }
  0x10   :  { %593 = vmatprep.mubr.msk.f32.mxu0 %vm64_vm0, %v47_v2  ;;  %590 = vmatpush3.msra.mxu0 %v56_v0  ;;  %v50_v5 = vld [vmem:[%s853_s0 + $0x18] sm:$0xff]  ;;  %v51_v6 = vld [vmem:[%s853_s0 + $0x20] sm:$0xff]  ;;  %v52_v7 = vld [vmem:[%s853_s0 + $0x28] sm:$0xff]  ;;  %vm280_vm4 = vcmask 1042434   ;;  %vm282_vm5 = vcmask 1043459   ;;  %vm284_vm6 = vcmask 1044484  }
  0x11   :  { %591 = vmatprep.subr.mxu0 %v55_v1  ;;  %v53_v8 = vld [vmem:[%s853_s0 + $0x30] sm:$0xff]  ;;  %v54_v9 = vld [vmem:[%s853_s0 + $0x38] sm:$0xff]  ;;  %v260_v13 = vld [vmem:[%s856_s3 + $0x8] sm:$0xff]  ;;  %613 = vmatprep.mubr.msk.f32.mxu1 %vm692_vm1, %v691_v10  ;;  %vm286_vm7 = vcmask 1045509   ;;  %vm288_vm8 = vcmask 1046534   ;;  %vm290_vm9 = vcmask 1047559  }
  0x12   :  { %592 = vmatpush3.msra.mxu0 %v55_v1  ;;  %v262_v11 = vld [vmem:[%s856_s3 + $0x18] sm:$0xff]  ;;  %v261_v12 = vld [vmem:[%s856_s3 + $0x10] sm:$0xff]  ;;  %v259_v14 = vld [vmem:[%s856_s3] sm:$0xff] }
  0x13   :  { %594 = vmatmul.mubr.msk.f32.vlgmr.msra.gmra.mxu0 %vm64_vm0, %v48_v3  ;;  %627 = vmatprep.subr.mxu0 %v691_v10  ;;  %v549_v15 = vld [vmem:[%s855_s2] ss:$0 sm:$0xff] }
  0x14   :  { %596 = vmatprep.mubr.msk.f32.mxu0 %vm64_vm0, %v49_v4  ;;  %606 = vmatpush3.msra.mxu1 %v262_v11 }
  0x15   :  { %607 = vmatprep.subr.mxu1 %v691_v10 }
  0x16   :  { %608 = vmatpush3.msra.mxu1 %v261_v12 }
  0x17   :  { %597 = vmatmul.mubr.msk.f32.gmra.mxu0 %vm64_vm0, %v50_v5  ;;  %609 = vmatprep.subr.mxu1 %v691_v10 }
  0x18   :  { %599 = vmatprep.mubr.msk.f32.mxu0 %vm64_vm0, %v51_v6  ;;  %610 = vmatpush3.msra.mxu1 %v260_v13 }
  0x19   :  { %611 = vmatprep.subr.mxu1 %v691_v10 }
  0x1a   :  { %612 = vmatpush3.msra.mxu1 %v259_v14 }
  0x1b   :  { %600 = vmatmul.mubr.msk.f32.gmra.mxu0 %vm64_vm0, %v52_v7  ;;  %616 = vmatprep.subr.mxu1 %v691_v10 }
  0x1c   :  { %602 = vmatprep.mubr.msk.f32.mxu0 %vm64_vm0, %v53_v8 }
  0x1f   :  { %603 = vmatmul.mubr.msk.f32.gmra.mxu0 %vm64_vm0, %v54_v9 }
  0x20   :  { %635 = vmatprep.mubr.msk.f32.mxu0 %vm692_vm1, %v691_v10 }
  0xd3   :  { %v595_v16 = vpop.f32.mrf.mxu0 }
  0xd4   :  { %v161_v17 = vadd.f32 %v595_v16, %v549_v15 }
  0xd5   :  { %v155_v18 = vpop.f32.mrf.mxu0 }
  0xd6   :  { %v195_v19 = vmax.f32 %v161_v17, 0.0  ;;  %v156_v20 = vadd.f32 %v549_v15, %v155_v18 }
  0xd7   :  { %v598_v21 = vpop.f32.mrf.mxu0 }
  0xd8   :  { %v210_v22 = vsel %vm202_vm2, %v195_v19, 0.0  ;;  %v194_v23 = vmax.f32 %v156_v20, 0.0  ;;  %v171_v24 = vadd.f32 %v598_v21, %v549_v15 }
  0xd9   :  { %v211_v25 = vrot.slane %v210_v22, 4  ;;  %v165_v26 = vpop.f32.mrf.mxu0 }
  0xda   :  { %v203_v27 = vsel %vm202_vm2, %v194_v23, 0.0  ;;  %v197_v28 = vmax.f32 %v171_v24, 0.0  ;;  %v166_v29 = vadd.f32 %v549_v15, %v165_v26 }
  0xdb   :  { %v212_v30 = vadd.f32 %v211_v25, %v210_v22  ;;  %v204_v31 = vrot.slane %v203_v27, 4  ;;  %v601_v32 = vpop.f32.mrf.mxu0 }
  0xdc   :  { %v224_v33 = vsel %vm202_vm2, %v197_v28, 0.0  ;;  %v196_v34 = vmax.f32 %v166_v29, 0.0  ;;  %v181_v35 = vadd.f32 %v601_v32, %v549_v15 }
  0xdd   :  { %v213_v36 = vrot.slane %v212_v30, 2  ;;  %v205_v37 = vadd.f32 %v204_v31, %v203_v27  ;;  %v225_v38 = vrot.slane %v224_v33, 4  ;;  %v175_v39 = vpop.f32.mrf.mxu0 }
  0xde   :  { %v217_v40 = vsel %vm202_vm2, %v196_v34, 0.0  ;;  %v199_v41 = vmax.f32 %v181_v35, 0.0  ;;  %v176_v42 = vadd.f32 %v549_v15, %v175_v39  ;;  %v367_v39 = vld [vmem:[%s858_s5 + $0x18] sm:$0xff] }
  0xdf   :  { %v214_v43 = vadd.f32 %v213_v36, %v212_v30  ;;  %v206_v44 = vrot.slane %v205_v37, 2  ;;  %v226_v45 = vadd.f32 %v225_v38, %v224_v33  ;;  %v218_v46 = vrot.slane %v217_v40, 4  ;;  %v604_v47 = vpop.f32.mrf.mxu0 }
  0xe0   :  { %v238_v48 = vsel %vm202_vm2, %v199_v41, 0.0  ;;  %v198_v49 = vmax.f32 %v176_v42, 0.0  ;;  %v191_v50 = vadd.f32 %v604_v47, %v549_v15  ;;  %v366_v41 = vld [vmem:[%s858_s5 + $0x10] sm:$0xff]  ;;  %v365_v42 = vld [vmem:[%s858_s5 + $0x8] sm:$0xff]  ;;  %v558_v47 = vld [vmem:[%s857_s4] ss:$0 sm:$0xff] }
  0xe1   :  { %v207_v51 = vadd.f32 %v206_v44, %v205_v37  ;;  %v227_v52 = vrot.slane %v226_v45, 2  ;;  %v219_v53 = vadd.f32 %v218_v46, %v217_v40  ;;  %v185_v54 = vpop.f32.mrf.mxu0  ;;  %v239_v55 = vrot.slane %v238_v48, 4  ;;  %v452_v44 = vld [vmem:[#allocation2 + $0x18] sm:$0xff]  ;;  %v450_v46 = vld [vmem:[#allocation2 + $0x8] sm:$0xff]  ;;  %s693_s4 = smov [#allocation5]  }
  0xe2   :  { %v231_v56 = vsel %vm202_vm2, %v198_v49, 0.0  ;;  %v201_v57 = vmax.f32 %v191_v50, 0.0  ;;  %v186_v58 = vadd.f32 %v549_v15, %v185_v54  ;;  %v215_v59 = vrot.slane %v214_v43, 1  ;;  %628 = vmatpush3.msra.mxu0 %v452_v44  ;;  %s540_s10 = sshll.u32 %s693_s4, 4  ;;  %s541_s10 = int_to_ptr.vmem [resolvable:$true] %s540_s10 }
  0xe3   :  { %v208_v60 = vrot.slane %v207_v51, 1  ;;  %v220_v61 = vrot.slane %v219_v53, 2  ;;  %v240_v62 = vadd.f32 %v239_v55, %v238_v48  ;;  %v232_v63 = vrot.slane %v231_v56, 4  ;;  %629 = vmatprep.subr.mxu0 %v691_v10  ;;  %s664_s11 = scalar_lea.vmem %s541_s10, 128  ;;  %p669_p6 = scmp.lt.s32.totalorder %s541_s10, %s541_s10 }
  0xe4   :  { %v252_v0 = vsel %vm202_vm2, %v201_v57, 0.0  ;;  %v200_v1 = vmax.f32 %v186_v58, 0.0  ;;  %v228_v2 = vadd.f32 %v227_v52, %v226_v45  ;;  %v216_v12 = vadd.f32 %v215_v59, %v214_v43  ;;  %v364_v43 = vld [vmem:[%s858_s5] sm:$0xff]  ;;  %v451_v45 = vld [vmem:[#allocation2 + $0x10] sm:$0xff]  ;;  %p665_p5 = scmp.ne.s32.totalorder %s541_s10, %s664_s11  ;;  %p670_p7 = scmp.lt.s32.totalorder %s664_s11, %s664_s11 }
  0xe5   :  { %v221_v3 = vadd.f32 %v220_v61, %v219_v53  ;;  %v253_v4 = vrot.slane %v252_v0, 4  ;;  %v241_v5 = vrot.slane %v240_v62, 2  ;;  %v233_v6 = vadd.f32 %v232_v63, %v231_v56  ;;  %630 = vmatpush3.msra.mxu0 %v451_v45  ;;  %v560_v52 = vld [vmem:[%s859_s6] ss:$0 sm:$0xff] }
  0xe6   :  { %v245_v7 = vsel %vm202_vm2, %v200_v1, 0.0  ;;  %v209_v8 = vadd.f32 %v208_v60, %v207_v51  ;;  %v229_v15 = vrot.slane %v228_v2, 1  ;;  %631 = vmatprep.subr.mxu0 %v691_v10  ;;  %v449_v51 = vld [vmem:[#allocation2] sm:$0xff]  ;;  %p671_p8 = por %p670_p7, %p669_p6 }
  0xe7   :  { %v222_v9 = vrot.slane %v221_v3, 1  ;;  %v254_v11 = vadd.f32 %v253_v4, %v252_v0  ;;  %v234_v13 = vrot.slane %v233_v6, 2  ;;  %v246_v14 = vrot.slane %v245_v7, 4  ;;  %632 = vmatpush3.msra.mxu0 %v450_v46 }
  0xe8   :  { %v242_v17 = vadd.f32 %v241_v5, %v240_v62  ;;  %v279_v21 = vsel %vm278_vm3, %v216_v12, %v209_v8  ;;  %v230_v26 = vadd.f32 %v229_v15, %v228_v2  ;;  %633 = vmatprep.subr.mxu0 %v691_v10  ;;  %p672_p9 = pnand %p671_p8, %p665_p5 }
  0xe9   :  { %v223_v16 = vadd.f32 %v222_v9, %v221_v3  ;;  %v255_v18 = vrot.slane %v254_v11, 2  ;;  %v235_v19 = vadd.f32 %v234_v13, %v233_v6  ;;  %v247_v20 = vadd.f32 %v246_v14, %v245_v7  ;;  %634 = vmatpush3.msra.mxu0 %v449_v51 }
  0xea   :  { %v243_v27 = vrot.slane %v242_v17, 1 }
  0xeb   :  { %v256_v22 = vadd.f32 %v255_v18, %v254_v11  ;;  %v281_v23 = vsel %vm280_vm4, %v223_v16, %v279_v21  ;;  %v236_v24 = vrot.slane %v235_v19, 1  ;;  %v248_v25 = vrot.slane %v247_v20, 2 }
  0xec   :  { %v283_v31 = vsel %vm282_vm5, %v230_v26, %v281_v23  ;;  %v244_v34 = vadd.f32 %v243_v27, %v242_v17 }
  0xed   :  { %v237_v28 = vadd.f32 %v236_v24, %v235_v19  ;;  %v249_v29 = vadd.f32 %v248_v25, %v247_v20  ;;  %v257_v30 = vrot.slane %v256_v22, 1 }
  0xef   :  { %v250_v32 = vrot.slane %v249_v29, 1  ;;  %v285_v33 = vsel %vm284_vm6, %v237_v28, %v283_v31  ;;  %v258_v36 = vadd.f32 %v257_v30, %v256_v22 }
  0xf0   :  { %v287_v37 = vsel %vm286_vm7, %v244_v34, %v285_v33 }
  0xf1   :  { %v251_v35 = vadd.f32 %v250_v32, %v249_v29 }
  0xf3   :  { %v289_v38 = vsel %vm288_vm8, %v251_v35, %v287_v37 }
  0xf4   :  { %v291_v40 = vsel %vm290_vm9, %v258_v36, %v289_v38 }
  0xf5   :  { %614 = vmatmul.mubr.msk.f32.vlgmr.msra.gmra.mxu1 %vm202_vm2, %v291_v40 }
  0xf6   :  { %617 = vmatpush3.msra.mxu1 %v367_v39  ;;  %624 = vmatprep.mubr.msk.f32.mxu1 %vm692_vm1, %v691_v10 }
  0xf7   :  { %618 = vmatprep.subr.mxu1 %v691_v10 }
  0xf8   :  { %619 = vmatpush3.msra.mxu1 %v366_v41 }
  0xf9   :  { %620 = vmatprep.subr.mxu1 %v691_v10 }
  0xfa   :  { %621 = vmatpush3.msra.mxu1 %v365_v42 }
  0xfb   :  { %622 = vmatprep.subr.mxu1 %v691_v10  ;;  %v562_v10 = vld [vmem:[%s861_s8] ss:$0 sm:$0xff] }
  0xfc   :  { %623 = vmatpush3.msra.mxu1 %v364_v43 }
 0x1b5   :  { %v360_v48 = vpop.f32.mrf.mxu1 }
 0x1b6   :  { %v361_v49 = vadd.f32 %v558_v47, %v360_v48 }
 0x1b7   :  { %v615_v50 = vpop.f32.mrf.mxu1 }
 0x1b8   :  { %625 = vmatmul.mubr.msk.f32.vlgmr.msra.gmra.mxu1 %vm202_vm2, %v361_v49 }
 0x278   :  { %v444_v53 = vpop.f32.mrf.mxu1 }
 0x279   :  { %v445_v54 = vadd.f32 %v560_v52, %v444_v53 }
 0x27a   :  { %v626_v55 = vpop.f32.mrf.mxu1 }
 0x27b   :  { %v448_v56 = vmax.f32 %v445_v54, 0.0 }
 0x27d   :  { %636 = vmatmul.mubr.msk.f32.vlgmr.msra.gmra.mxu0 %vm202_vm2, %v448_v56 }
 0x33d   :  { %v529_v57 = vpop.f32.mrf.mxu0 }
 0x33e   :  { %v530_v58 = vadd.f32 %v562_v10, %v529_v57 }
 0x33f   :  { %v637_v59 = vpop.f32.mrf.mxu0 }
 0x340   :  { %533 = vst [vmem:[#allocation5] sm:$0xff] %v530_v58 }
 0x341   :  { %675 = shalt.err (!%p672_p9)
}
 0x342   :  { %543 = dma.vmem_to_hbm [thread:$0]  %s541_s10, 128, %s862_s9, [#allocation4]  }
 0x343   :  { %686 = dma.done.wait [#allocation4], 128  }
 0x344   :  { %687 = vsyncadd [#allocation4], 4294967168 }
 0x345   :  { %547 = vsyncpa [#allocation3], 1 }
 0x346   :  { %548 = vsyncpa [#allocation4], 1 }

</bundles_post_ra>
